<compile_context>
chip_gen: v5e
topology: v5e:2x2
jax: 0.10.0
libtpu: 0.0.40
codegen_flags: <defaults>
</compile_context>

<pallas_src>
import functools

import jax
import jax.numpy as jnp
from jax.experimental import pallas as pl
from jax.experimental.pallas import tpu as pltpu


def _cheb_conv_kernel(cheb_t_ref, theta_big_ref, att_t_ref, x_ref, o_ref,
                      acc_ref, *, K, block_b):
    """One grid point = (chunk of block_b batches, chunk of block_n output rows).

    cheb_t_ref    : (K, block_n, N)           rows of T_k^T (bf16, shared over batch)
    theta_big_ref : (K, F_in*T, Lout_pad)     kron(Theta_k, I_T), zero-padded cols (bf16)
    att_t_ref     : (block_b, block_n, N)     rows of A^T per batch element (bf16)
    x_ref         : (block_b, N, F_in*T)      graph signal, time folded into lanes (bf16)
    o_ref         : (block_b, block_n, Lout_pad)  output block (f32, lane-dense)
    acc_ref       : (block_n, Lout_pad)       f32 VMEM accumulator scratch
    """
    for bb in range(block_b):                       # small static unrolled loop
        x_b = x_ref[bb]                             # (N, F_in*T)   bf16
        att_b = att_t_ref[bb]                       # (block_n, N)  bf16
        for k in range(K):                          # K static -> unrolled
            # rows of (T_k * A)^T == T_k^T * A^T : elementwise on the VPU.
            s_kt = cheb_t_ref[k] * att_b                                   # (block_n, N)
            # (block_n, N) @ (N, F_in*T) on the MXU, f32 accumulation.
            z = jnp.dot(s_kt, x_b, preferred_element_type=jnp.float32)     # (block_n, F_in*T)
            # Per-timestep Theta_k contraction as one block-diagonal matmul:
            # (block_n, F_in*T) @ (F_in*T, Lout_pad), bf16 operands, f32 acc.
            contrib = jnp.dot(z.astype(jnp.bfloat16), theta_big_ref[k],
                              preferred_element_type=jnp.float32)          # (block_n, Lout_pad)
            if k == 0:
                acc_ref[...] = contrib
            else:
                acc_ref[...] += contrib
        # ReLU + store (lane-dense, unmasked vector stores).
        o_ref[bb] = jnp.maximum(acc_ref[...], 0.0).astype(o_ref.dtype)


def cheb_conv_with_sat(x, spatial_attention, cheb_polynomials, theta,
                       *, block_b=None, block_n=None):
    """Pallas wrapper.

    x                 : (B, N, F_in, T)   float32
    spatial_attention : (B, N, N)         float32
    cheb_polynomials  : (K, N, N)         float32 (stacked list)
    theta             : (K, F_in, F_out)  float32 (stacked ParameterList)
    returns           : (B, N, F_out, T)  float32
    """
    B, N, F_in, T = x.shape
    K, _, F_out = theta.shape
    Lin = F_in * T
    Lout = F_out * T
    Lout_pad = ((Lout + 127) // 128) * 128          # lane-dense output (>=128, x128)

    if block_n is None:
        block_n = N if N <= 256 else 256
    if block_b is None:
        block_b = 1
    # bf16 inputs: a partial row tile must respect the 16-sublane packing.
    assert block_n == N or block_n % 16 == 0, \
        "block_n must equal N or be a multiple of 16 (bf16 sublane tile)"

    compute_dtype = jnp.bfloat16

    # --- wrapper-side layout plumbing (no activation transposes) ---
    # x: pure reshape, lane order = f_in*T + t.  Cast halves kernel DMA bytes.
    x_flat = x.reshape(B, N, Lin).astype(compute_dtype)
    # Pre-transpose graph operands so the kernel needs no XLU transpose:
    # (T_k * A)^T == T_k^T * A^T.  Transpose fuses with the bf16 cast.
    cheb_t = jnp.transpose(cheb_polynomials, (0, 2, 1)).astype(compute_dtype)   # (K, N, N)
    att_t = jnp.transpose(spatial_attention, (0, 2, 1)).astype(compute_dtype)   # (B, N, N)
    # kron(Theta_k, I_T): lane (f_in*T + t) -> lane (f_out*T + t); zero-pad the
    # output lanes up to a multiple of 128.
    eye_t = jnp.eye(T, dtype=theta.dtype)
    theta_big = jnp.einsum("kif,ts->kitfs", theta, eye_t).reshape(K, Lin, Lout)
    if Lout_pad != Lout:
        theta_big = jnp.pad(theta_big, ((0, 0), (0, 0), (0, Lout_pad - Lout)))
    theta_big = theta_big.astype(compute_dtype)

    grid = (pl.cdiv(B, block_b), pl.cdiv(N, block_n))
    kernel = functools.partial(_cheb_conv_kernel, K=K, block_b=block_b)

    out_flat = pl.pallas_call(
        kernel,
        out_shape=jax.ShapeDtypeStruct((B, N, Lout_pad), x.dtype),
        grid_spec=pltpu.PrefetchScalarGridSpec(
            num_scalar_prefetch=0,
            grid=grid,
            in_specs=[
                # Chebyshev rows (transposed): depend only on the row chunk.
                pl.BlockSpec((K, block_n, N), lambda b, r: (0, r, 0)),
                # Block-diagonal Theta weights: constant block index (shared).
                # (On v7x one may single-buffer this via pipeline_mode=pl.Buffered(1).)
                pl.BlockSpec((K, Lin, Lout_pad), lambda b, r: (0, 0, 0)),
                # Spatial attention rows (transposed): per batch-chunk + row-chunk.
                pl.BlockSpec((block_b, block_n, N), lambda b, r: (b, r, 0)),
                # Graph signal: full node slab per batch-chunk (needed for S^T @ x).
                pl.BlockSpec((block_b, N, Lin), lambda b, r: (b, 0, 0)),
            ],
            out_specs=pl.BlockSpec((block_b, block_n, Lout_pad),
                                   lambda b, r: (b, r, 0)),
            scratch_shapes=[pltpu.VMEM((block_n, Lout_pad), jnp.float32)],
        ),
        compiler_params=pltpu.CompilerParams(
            dimension_semantics=("parallel", "parallel"),
            # Above the 32 MiB scoped default, below v7x's 64 MiB physical VMEM.
            vmem_limit_bytes=56 * 1024 * 1024,
        ),
    )(cheb_t, theta_big, att_t, x_flat)

    out = out_flat[..., :Lout] if Lout_pad != Lout else out_flat
    # lane order f_out*T + t  ->  (B, N, F_out, T) is a pure reshape.
    return out.reshape(B, N, F_out, T)


def _reference(x, spatial_attention, cheb_polynomials, theta):
    """Pure-JAX f32 reference mirroring the PyTorch loop semantics."""
    B, N, F_in, T = x.shape
    K, _, F_out = theta.shape
    outs = []
    for t in range(T):
        gs = x[:, :, :, t]                                      # (B, N, F_in)
        out = jnp.zeros((B, N, F_out), dtype=x.dtype)
        for k in range(K):
            t_k_with_at = cheb_polynomials[k] * spatial_attention        # (B, N, N)
            rhs = jnp.matmul(jnp.transpose(t_k_with_at, (0, 2, 1)), gs)  # (B, N, F_in)
            out = out + jnp.matmul(rhs, theta[k])                        # (B, N, F_out)
        outs.append(out[..., None])
    return jax.nn.relu(jnp.concatenate(outs, axis=-1))


if __name__ == "__main__":
    # Small shapes consistent with the module: x (B, N, F_in, T).
    B, N, F_in, F_out, T, K = 4, 32, 4, 8, 8, 3

    key = jax.random.PRNGKey(0)
    k_x, k_att, k_cheb, k_theta = jax.random.split(key, 4)

    x = jax.random.normal(k_x, (B, N, F_in, T), dtype=jnp.float32)
    spatial_attention = jax.random.uniform(k_att, (B, N, N), dtype=jnp.float32)
    # Deterministic synthetic Chebyshev polynomial tensors (N x N each).
    cheb_polynomials = jax.random.normal(k_cheb, (K, N, N), dtype=jnp.float32)
    # Theta parameters (stand-in for the uninitialized torch.FloatTensor params).
    theta = 0.1 * jax.random.normal(k_theta, (K, F_in, F_out), dtype=jnp.float32)

    # block_b=2, block_n=16 -> grid (2, 2): exercises batch chunking, the
    # in-kernel batch loop, row tiling, and the 64->128 output lane padding.
    fn = jax.jit(functools.partial(cheb_conv_with_sat, block_b=2, block_n=16))
    out = jax.block_until_ready(fn(x, spatial_attention, cheb_polynomials, theta))

    ref = _reference(x, spatial_attention, cheb_polynomials, theta)
    assert out.shape == (B, N, F_out, T)
    # bf16 MXU operands with f32 accumulation -> relaxed tolerance vs f32 reference.
    assert jnp.allclose(out, ref, atol=5e-2, rtol=5e-2), "mismatch vs reference"

    print("KERNEL_OK")
</pallas_src>

<mosaic_0001>
module attributes {stable_mosaic.version = 11 : i64} {
  func.func @_cheb_conv_kernel(%arg0: i32, %arg1: i32, %arg2: memref<3x16x32xbf16, #tpu.memory_space<vmem>>, %arg3: memref<3x32x128xbf16, #tpu.memory_space<vmem>>, %arg4: memref<2x16x32xbf16, #tpu.memory_space<vmem>>, %arg5: memref<2x32x32xbf16, #tpu.memory_space<vmem>>, %arg6: memref<2x16x128xf32, #tpu.memory_space<vmem>>, %arg7: memref<16x128xf32, #tpu.memory_space<vmem>>) attributes {dimension_semantics = [#tpu.dimension_semantics<parallel>, #tpu.dimension_semantics<parallel>], iteration_bounds = array<i64: 2, 2>, scalar_prefetch = 0 : i64, scratch_operands = 1 : i64, tpu.core_type = #tpu.core_type<tc>, window_params = [{transform_indices = @transform_0, window_bounds = array<i64: 3, 16, 32>}, {pipeline_mode = #tpu.pipeline_mode<synchronous>, transform_indices = @transform_1, window_bounds = array<i64: 3, 32, 128>}, {transform_indices = @transform_2, window_bounds = array<i64: 2, 16, 32>}, {transform_indices = @transform_3, window_bounds = array<i64: 2, 32, 32>}, {transform_indices = @transform_4, window_bounds = array<i64: 2, 16, 128>}]} {
    %c0 = arith.constant 0 : index
    %c0_0 = arith.constant 0 : index
    %c0_1 = arith.constant 0 : index
    %0 = vector.load %arg5[%c0, %c0_0, %c0_1] : memref<2x32x32xbf16, #tpu.memory_space<vmem>>, vector<1x32x32xbf16>
    %1 = vector.shape_cast %0 : vector<1x32x32xbf16> to vector<32x32xbf16>
    %c0_2 = arith.constant 0 : index
    %c0_3 = arith.constant 0 : index
    %c0_4 = arith.constant 0 : index
    %2 = vector.load %arg4[%c0_2, %c0_3, %c0_4] : memref<2x16x32xbf16, #tpu.memory_space<vmem>>, vector<1x16x32xbf16>
    %3 = vector.shape_cast %2 : vector<1x16x32xbf16> to vector<16x32xbf16>
    %c0_5 = arith.constant 0 : index
    %c0_6 = arith.constant 0 : index
    %c0_7 = arith.constant 0 : index
    %4 = vector.load %arg2[%c0_5, %c0_6, %c0_7] : memref<3x16x32xbf16, #tpu.memory_space<vmem>>, vector<1x16x32xbf16>
    %5 = vector.shape_cast %4 : vector<1x16x32xbf16> to vector<16x32xbf16>
    %6 = arith.mulf %5, %3 : vector<16x32xbf16>
    %cst = arith.constant dense<0.000000e+00> : vector<16x32xf32>
    %7 = tpu.matmul %6, %1, %cst {dimension_numbers = #tpu.dot_dimension_numbers<[1], [0], [0], [1], [0, 0, 1, 1], [], []>} : vector<16x32xbf16>, vector<32x32xbf16>, vector<16x32xf32> -> vector<16x32xf32>
    %8 = arith.truncf %7 : vector<16x32xf32> to vector<16x32xbf16>
    %c0_8 = arith.constant 0 : index
    %c0_9 = arith.constant 0 : index
    %c0_10 = arith.constant 0 : index
    %9 = vector.load %arg3[%c0_8, %c0_9, %c0_10] : memref<3x32x128xbf16, #tpu.memory_space<vmem>>, vector<1x32x128xbf16>
    %10 = vector.shape_cast %9 : vector<1x32x128xbf16> to vector<32x128xbf16>
    %cst_11 = arith.constant dense<0.000000e+00> : vector<16x128xf32>
    %11 = tpu.matmul %8, %10, %cst_11 {dimension_numbers = #tpu.dot_dimension_numbers<[1], [0], [0], [1], [0, 0, 1, 1], [], []>} : vector<16x32xbf16>, vector<32x128xbf16>, vector<16x128xf32> -> vector<16x128xf32>
    %c0_12 = arith.constant 0 : index
    %c0_13 = arith.constant 0 : index
    %12 = vector.load %arg7[%c0_12, %c0_13] : memref<16x128xf32, #tpu.memory_space<vmem>>, vector<16x128xf32>
    tpu.vector_store %arg7[%c0_12, %c0_13], %11 {strides = array<i32>} : memref<16x128xf32, #tpu.memory_space<vmem>>, vector<16x128xf32>,
    %c1 = arith.constant 1 : index
    %c0_14 = arith.constant 0 : index
    %c0_15 = arith.constant 0 : index
    %13 = vector.load %arg2[%c1, %c0_14, %c0_15] : memref<3x16x32xbf16, #tpu.memory_space<vmem>>, vector<1x16x32xbf16>
    %14 = vector.shape_cast %13 : vector<1x16x32xbf16> to vector<16x32xbf16>
    %15 = arith.mulf %14, %3 : vector<16x32xbf16>
    %cst_16 = arith.constant dense<0.000000e+00> : vector<16x32xf32>
    %16 = tpu.matmul %15, %1, %cst_16 {dimension_numbers = #tpu.dot_dimension_numbers<[1], [0], [0], [1], [0, 0, 1, 1], [], []>} : vector<16x32xbf16>, vector<32x32xbf16>, vector<16x32xf32> -> vector<16x32xf32>
    %17 = arith.truncf %16 : vector<16x32xf32> to vector<16x32xbf16>
    %c1_17 = arith.constant 1 : index
    %c0_18 = arith.constant 0 : index
    %c0_19 = arith.constant 0 : index
    %18 = vector.load %arg3[%c1_17, %c0_18, %c0_19] : memref<3x32x128xbf16, #tpu.memory_space<vmem>>, vector<1x32x128xbf16>
    %19 = vector.shape_cast %18 : vector<1x32x128xbf16> to vector<32x128xbf16>
    %cst_20 = arith.constant dense<0.000000e+00> : vector<16x128xf32>
    %20 = tpu.matmul %17, %19, %cst_20 {dimension_numbers = #tpu.dot_dimension_numbers<[1], [0], [0], [1], [0, 0, 1, 1], [], []>} : vector<16x32xbf16>, vector<32x128xbf16>, vector<16x128xf32> -> vector<16x128xf32>
    %c0_21 = arith.constant 0 : index
    %c0_22 = arith.constant 0 : index
    %21 = vector.load %arg7[%c0_21, %c0_22] : memref<16x128xf32, #tpu.memory_space<vmem>>, vector<16x128xf32>
    %22 = arith.addf %21, %20 : vector<16x128xf32>
    %c0_23 = arith.constant 0 : index
    %c0_24 = arith.constant 0 : index
    %23 = vector.load %arg7[%c0_23, %c0_24] : memref<16x128xf32, #tpu.memory_space<vmem>>, vector<16x128xf32>
    tpu.vector_store %arg7[%c0_23, %c0_24], %22 {strides = array<i32>} : memref<16x128xf32, #tpu.memory_space<vmem>>, vector<16x128xf32>,
    %c2 = arith.constant 2 : index
    %c0_25 = arith.constant 0 : index
    %c0_26 = arith.constant 0 : index
    %24 = vector.load %arg2[%c2, %c0_25, %c0_26] : memref<3x16x32xbf16, #tpu.memory_space<vmem>>, vector<1x16x32xbf16>
    %25 = vector.shape_cast %24 : vector<1x16x32xbf16> to vector<16x32xbf16>
    %26 = arith.mulf %25, %3 : vector<16x32xbf16>
    %cst_27 = arith.constant dense<0.000000e+00> : vector<16x32xf32>
    %27 = tpu.matmul %26, %1, %cst_27 {dimension_numbers = #tpu.dot_dimension_numbers<[1], [0], [0], [1], [0, 0, 1, 1], [], []>} : vector<16x32xbf16>, vector<32x32xbf16>, vector<16x32xf32> -> vector<16x32xf32>
    %28 = arith.truncf %27 : vector<16x32xf32> to vector<16x32xbf16>
    %c2_28 = arith.constant 2 : index
    %c0_29 = arith.constant 0 : index
    %c0_30 = arith.constant 0 : index
    %29 = vector.load %arg3[%c2_28, %c0_29, %c0_30] : memref<3x32x128xbf16, #tpu.memory_space<vmem>>, vector<1x32x128xbf16>
    %30 = vector.shape_cast %29 : vector<1x32x128xbf16> to vector<32x128xbf16>
    %cst_31 = arith.constant dense<0.000000e+00> : vector<16x128xf32>
    %31 = tpu.matmul %28, %30, %cst_31 {dimension_numbers = #tpu.dot_dimension_numbers<[1], [0], [0], [1], [0, 0, 1, 1], [], []>} : vector<16x32xbf16>, vector<32x128xbf16>, vector<16x128xf32> -> vector<16x128xf32>
    %c0_32 = arith.constant 0 : index
    %c0_33 = arith.constant 0 : index
    %32 = vector.load %arg7[%c0_32, %c0_33] : memref<16x128xf32, #tpu.memory_space<vmem>>, vector<16x128xf32>
    %33 = arith.addf %32, %31 : vector<16x128xf32>
    %c0_34 = arith.constant 0 : index
    %c0_35 = arith.constant 0 : index
    %34 = vector.load %arg7[%c0_34, %c0_35] : memref<16x128xf32, #tpu.memory_space<vmem>>, vector<16x128xf32>
    tpu.vector_store %arg7[%c0_34, %c0_35], %33 {strides = array<i32>} : memref<16x128xf32, #tpu.memory_space<vmem>>, vector<16x128xf32>,
    %c0_36 = arith.constant 0 : index
    %c0_37 = arith.constant 0 : index
    %35 = vector.load %arg7[%c0_36, %c0_37] : memref<16x128xf32, #tpu.memory_space<vmem>>, vector<16x128xf32>
    %cst_38 = arith.constant 0.000000e+00 : f32
    %36 = vector.broadcast %cst_38 : f32 to vector<16x128xf32>
    %37 = arith.maximumf %35, %36 : vector<16x128xf32>
    %c0_39 = arith.constant 0 : index
    %c0_40 = arith.constant 0 : index
    %c0_41 = arith.constant 0 : index
    %38 = vector.load %arg6[%c0_39, %c0_40, %c0_41] : memref<2x16x128xf32, #tpu.memory_space<vmem>>, vector<1x16x128xf32>
    %39 = vector.shape_cast %38 : vector<1x16x128xf32> to vector<16x128xf32>
    %40 = vector.shape_cast %37 : vector<16x128xf32> to vector<1x16x128xf32>
    tpu.vector_store %arg6[%c0_39, %c0_40, %c0_41], %40 {strides = array<i32>} : memref<2x16x128xf32, #tpu.memory_space<vmem>>, vector<1x16x128xf32>,
    %c1_42 = arith.constant 1 : index
    %c0_43 = arith.constant 0 : index
    %c0_44 = arith.constant 0 : index
    %41 = vector.load %arg5[%c1_42, %c0_43, %c0_44] : memref<2x32x32xbf16, #tpu.memory_space<vmem>>, vector<1x32x32xbf16>
    %42 = vector.shape_cast %41 : vector<1x32x32xbf16> to vector<32x32xbf16>
    %c1_45 = arith.constant 1 : index
    %c0_46 = arith.constant 0 : index
    %c0_47 = arith.constant 0 : index
    %43 = vector.load %arg4[%c1_45, %c0_46, %c0_47] : memref<2x16x32xbf16, #tpu.memory_space<vmem>>, vector<1x16x32xbf16>
    %44 = vector.shape_cast %43 : vector<1x16x32xbf16> to vector<16x32xbf16>
    %c0_48 = arith.constant 0 : index
    %c0_49 = arith.constant 0 : index
    %c0_50 = arith.constant 0 : index
    %45 = vector.load %arg2[%c0_48, %c0_49, %c0_50] : memref<3x16x32xbf16, #tpu.memory_space<vmem>>, vector<1x16x32xbf16>
    %46 = vector.shape_cast %45 : vector<1x16x32xbf16> to vector<16x32xbf16>
    %47 = arith.mulf %46, %44 : vector<16x32xbf16>
    %cst_51 = arith.constant dense<0.000000e+00> : vector<16x32xf32>
    %48 = tpu.matmul %47, %42, %cst_51 {dimension_numbers = #tpu.dot_dimension_numbers<[1], [0], [0], [1], [0, 0, 1, 1], [], []>} : vector<16x32xbf16>, vector<32x32xbf16>, vector<16x32xf32> -> vector<16x32xf32>
    %49 = arith.truncf %48 : vector<16x32xf32> to vector<16x32xbf16>
    %c0_52 = arith.constant 0 : index
    %c0_53 = arith.constant 0 : index
    %c0_54 = arith.constant 0 : index
    %50 = vector.load %arg3[%c0_52, %c0_53, %c0_54] : memref<3x32x128xbf16, #tpu.memory_space<vmem>>, vector<1x32x128xbf16>
    %51 = vector.shape_cast %50 : vector<1x32x128xbf16> to vector<32x128xbf16>
    %cst_55 = arith.constant dense<0.000000e+00> : vector<16x128xf32>
    %52 = tpu.matmul %49, %51, %cst_55 {dimension_numbers = #tpu.dot_dimension_numbers<[1], [0], [0], [1], [0, 0, 1, 1], [], []>} : vector<16x32xbf16>, vector<32x128xbf16>, vector<16x128xf32> -> vector<16x128xf32>
    %c0_56 = arith.constant 0 : index
    %c0_57 = arith.constant 0 : index
    %53 = vector.load %arg7[%c0_56, %c0_57] : memref<16x128xf32, #tpu.memory_space<vmem>>, vector<16x128xf32>
    tpu.vector_store %arg7[%c0_56, %c0_57], %52 {strides = array<i32>} : memref<16x128xf32, #tpu.memory_space<vmem>>, vector<16x128xf32>,
    %c1_58 = arith.constant 1 : index
    %c0_59 = arith.constant 0 : index
    %c0_60 = arith.constant 0 : index
    %54 = vector.load %arg2[%c1_58, %c0_59, %c0_60] : memref<3x16x32xbf16, #tpu.memory_space<vmem>>, vector<1x16x32xbf16>
    %55 = vector.shape_cast %54 : vector<1x16x32xbf16> to vector<16x32xbf16>
    %56 = arith.mulf %55, %44 : vector<16x32xbf16>
    %cst_61 = arith.constant dense<0.000000e+00> : vector<16x32xf32>
    %57 = tpu.matmul %56, %42, %cst_61 {dimension_numbers = #tpu.dot_dimension_numbers<[1], [0], [0], [1], [0, 0, 1, 1], [], []>} : vector<16x32xbf16>, vector<32x32xbf16>, vector<16x32xf32> -> vector<16x32xf32>
    %58 = arith.truncf %57 : vector<16x32xf32> to vector<16x32xbf16>
    %c1_62 = arith.constant 1 : index
    %c0_63 = arith.constant 0 : index
    %c0_64 = arith.constant 0 : index
    %59 = vector.load %arg3[%c1_62, %c0_63, %c0_64] : memref<3x32x128xbf16, #tpu.memory_space<vmem>>, vector<1x32x128xbf16>
    %60 = vector.shape_cast %59 : vector<1x32x128xbf16> to vector<32x128xbf16>
    %cst_65 = arith.constant dense<0.000000e+00> : vector<16x128xf32>
    %61 = tpu.matmul %58, %60, %cst_65 {dimension_numbers = #tpu.dot_dimension_numbers<[1], [0], [0], [1], [0, 0, 1, 1], [], []>} : vector<16x32xbf16>, vector<32x128xbf16>, vector<16x128xf32> -> vector<16x128xf32>
    %c0_66 = arith.constant 0 : index
    %c0_67 = arith.constant 0 : index
    %62 = vector.load %arg7[%c0_66, %c0_67] : memref<16x128xf32, #tpu.memory_space<vmem>>, vector<16x128xf32>
    %63 = arith.addf %62, %61 : vector<16x128xf32>
    %c0_68 = arith.constant 0 : index
    %c0_69 = arith.constant 0 : index
    %64 = vector.load %arg7[%c0_68, %c0_69] : memref<16x128xf32, #tpu.memory_space<vmem>>, vector<16x128xf32>
    tpu.vector_store %arg7[%c0_68, %c0_69], %63 {strides = array<i32>} : memref<16x128xf32, #tpu.memory_space<vmem>>, vector<16x128xf32>,
    %c2_70 = arith.constant 2 : index
    %c0_71 = arith.constant 0 : index
    %c0_72 = arith.constant 0 : index
    %65 = vector.load %arg2[%c2_70, %c0_71, %c0_72] : memref<3x16x32xbf16, #tpu.memory_space<vmem>>, vector<1x16x32xbf16>
    %66 = vector.shape_cast %65 : vector<1x16x32xbf16> to vector<16x32xbf16>
    %67 = arith.mulf %66, %44 : vector<16x32xbf16>
    %cst_73 = arith.constant dense<0.000000e+00> : vector<16x32xf32>
    %68 = tpu.matmul %67, %42, %cst_73 {dimension_numbers = #tpu.dot_dimension_numbers<[1], [0], [0], [1], [0, 0, 1, 1], [], []>} : vector<16x32xbf16>, vector<32x32xbf16>, vector<16x32xf32> -> vector<16x32xf32>
    %69 = arith.truncf %68 : vector<16x32xf32> to vector<16x32xbf16>
    %c2_74 = arith.constant 2 : index
    %c0_75 = arith.constant 0 : index
    %c0_76 = arith.constant 0 : index
    %70 = vector.load %arg3[%c2_74, %c0_75, %c0_76] : memref<3x32x128xbf16, #tpu.memory_space<vmem>>, vector<1x32x128xbf16>
    %71 = vector.shape_cast %70 : vector<1x32x128xbf16> to vector<32x128xbf16>
    %cst_77 = arith.constant dense<0.000000e+00> : vector<16x128xf32>
    %72 = tpu.matmul %69, %71, %cst_77 {dimension_numbers = #tpu.dot_dimension_numbers<[1], [0], [0], [1], [0, 0, 1, 1], [], []>} : vector<16x32xbf16>, vector<32x128xbf16>, vector<16x128xf32> -> vector<16x128xf32>
    %c0_78 = arith.constant 0 : index
    %c0_79 = arith.constant 0 : index
    %73 = vector.load %arg7[%c0_78, %c0_79] : memref<16x128xf32, #tpu.memory_space<vmem>>, vector<16x128xf32>
    %74 = arith.addf %73, %72 : vector<16x128xf32>
    %c0_80 = arith.constant 0 : index
    %c0_81 = arith.constant 0 : index
    %75 = vector.load %arg7[%c0_80, %c0_81] : memref<16x128xf32, #tpu.memory_space<vmem>>, vector<16x128xf32>
    tpu.vector_store %arg7[%c0_80, %c0_81], %74 {strides = array<i32>} : memref<16x128xf32, #tpu.memory_space<vmem>>, vector<16x128xf32>,
    %c0_82 = arith.constant 0 : index
    %c0_83 = arith.constant 0 : index
    %76 = vector.load %arg7[%c0_82, %c0_83] : memref<16x128xf32, #tpu.memory_space<vmem>>, vector<16x128xf32>
    %cst_84 = arith.constant 0.000000e+00 : f32
    %77 = vector.broadcast %cst_84 : f32 to vector<16x128xf32>
    %78 = arith.maximumf %76, %77 : vector<16x128xf32>
    %c1_85 = arith.constant 1 : index
    %c0_86 = arith.constant 0 : index
    %c0_87 = arith.constant 0 : index
    %79 = vector.load %arg6[%c1_85, %c0_86, %c0_87] : memref<2x16x128xf32, #tpu.memory_space<vmem>>, vector<1x16x128xf32>
    %80 = vector.shape_cast %79 : vector<1x16x128xf32> to vector<16x128xf32>
    %81 = vector.shape_cast %78 : vector<16x128xf32> to vector<1x16x128xf32>
    tpu.vector_store %arg6[%c1_85, %c0_86, %c0_87], %81 {strides = array<i32>} : memref<2x16x128xf32, #tpu.memory_space<vmem>>, vector<1x16x128xf32>,
    return
  }
  func.func @transform_0(%arg0: i32, %arg1: i32) -> (i32, i32, i32) {
    %c0_i32 = arith.constant 0 : i32
    %c0_i32_0 = arith.constant 0 : i32
    %c0_i32_1 = arith.constant 0 : i32
    return %c0_i32, %arg1, %c0_i32_0 : i32, i32, i32
  }
  func.func @transform_1(%arg0: i32, %arg1: i32) -> (i32, i32, i32) {
    %c0_i32 = arith.constant 0 : i32
    %c0_i32_0 = arith.constant 0 : i32
    %c0_i32_1 = arith.constant 0 : i32
    %c0_i32_2 = arith.constant 0 : i32
    return %c0_i32, %c0_i32_0, %c0_i32_1 : i32, i32, i32
  }
  func.func @transform_2(%arg0: i32, %arg1: i32) -> (i32, i32, i32) {
    %c0_i32 = arith.constant 0 : i32
    %c0_i32_0 = arith.constant 0 : i32
    return %arg0, %arg1, %c0_i32 : i32, i32, i32
  }
  func.func @transform_3(%arg0: i32, %arg1: i32) -> (i32, i32, i32) {
    %c0_i32 = arith.constant 0 : i32
    %c0_i32_0 = arith.constant 0 : i32
    %c0_i32_1 = arith.constant 0 : i32
    return %arg0, %c0_i32, %c0_i32_0 : i32, i32, i32
  }
  func.func @transform_4(%arg0: i32, %arg1: i32) -> (i32, i32, i32) {
    %c0_i32 = arith.constant 0 : i32
    %c0_i32_0 = arith.constant 0 : i32
    return %arg0, %arg1, %c0_i32 : i32, i32, i32
  }
}

</mosaic_0001>

<bundles_post_ra>
// kernel: cheb_conv_with_sat.1
= control target key start
LH: loop header
LB: loop body
LE: loop exit
PB: predicated region body
PF: predicated region fallthrough
CT: control target
= control target key end

     0   :  { %s1340_s15 = smov 0   ;;  %s1342_s16 = smov 0   ;;  %s1550_s0 = inlined_call_operand.vmem [shape: bf16[3,32,32], index: 0, kind: input, shape index: {}]   ;;  %s1551_s1 = inlined_call_operand.vmem [shape: bf16[3,32,128], index: 1, kind: input, shape index: {}]   ;;  %s1552_s2 = inlined_call_operand.vmem [shape: bf16[4,32,32], index: 2, kind: input, shape index: {}]   ;;  %s1553_s3 = inlined_call_operand.vmem [shape: bf16[4,32,32], index: 3, kind: input, shape index: {}]   ;;  %s1554_s4 = inlined_call_operand.vmem [shape: f32[4,32,128], index: 4, kind: output, shape index: {}]  }
   0x1   :  { %s1344_s17 = smov 0   ;;  %s1346_s18 = smov 0  }
   0x2   :  { %s1348_s19 = smov 0   ;;  %s1350_s20 = smov 0  }
   0x3   :  { %s1352_s21 = smov 0   ;;  %s1354_s22 = smov 0  }
   0x4   :  { %s1356_s23 = smov 0  }
   0x5 LB: > { %s980_s24 = sadd.s32 4294967295, %s1313_s23   ;;  %s23_s25 = sadd.s32 1, %s1305_s21  ;;  %s1313_s23 = sphi %s1356_s23, %s14_s23   ;;  %s1309_s22 = sphi %s1354_s22, %s1565_s22   ;;  %s1305_s21 = sphi %s1352_s21, %s1564_s21   ;;  %s1301_s20 = sphi %s1350_s20, %s1563_s20   ;;  %s1297_s19 = sphi %s1348_s19, %s1562_s19   ;;  %s1293_s18 = sphi %s1346_s18, %s1561_s18   ;;  %s1289_s17 = sphi %s1344_s17, %s1560_s17   ;;  %s1285_s16 = sphi %s1342_s16, %s1559_s16   ;;  %s1281_s15 = sphi %s1340_s15, %s1558_s15  }
   0x6   : > { %p24_p0 = scmp.ge.s32.totalorder %s23_s25, 2  ;;  %s26_s26 = sadd.s32 1, %s1309_s22 }
   0x7   : > { %s33_s27 = sadd.s32 1, %s1293_s18  ;;  %p40_p1 = scmp.ne.s32.totalorder %s1293_s18, %s1289_s17 }
   0x8   : > { %s1567_s25 = smov (%p24_p0, %s23_s25), 0  ;;  %s1569_s26 = smov (!%p24_p0, %s26_s26), %s1309_s22 }
   0x9   : > { %s30_s28 = ssub.s32 %s1305_s21, %s1567_s25  ;;  %p41_p2 = scmp.eq.s32.totalorder %s1313_s23, 0 }
   0xa   : > { %p28_p3 = scmp.ge.s32.totalorder %s1569_s26, 2  ;;  %p31_p4 = scmp.eq.s32.totalorder %s30_s28, 0 }
   0xb   : > { %p1397_p5 = por %p41_p2, %p40_p1  ;;  %s82_s30 = sadd.s32 1, %s1285_s16 }
   0xc   : > { %s1571_s26 = smov (%p28_p3, %s1569_s26), 0  ;;  %p89_p6 = scmp.ne.s32.totalorder %s1285_s16, %s1281_s15 }
   0xd   : > { %s1405_s5 = scalar_select %p31_p4, %s1293_s18, %s33_s27  }
   0xe   : > { %s77_s6 = ssub.s32 %s1309_s22, %s1571_s26  ;;  %p147_p7 = scmp.eq.s32.totalorder %s980_s24, 3 }
   0xf   : > { %s79_s7 = sor.u32 %s77_s6, %s30_s28  ;;  %p1411_p9 = por %p89_p6, %p41_p2 }
  0x10   : > { %p80_p8 = scmp.eq.s32.totalorder %s79_s7, 0  ;;  %p1415_p10 = por %p147_p7, %p89_p6 }
  0x11   : > { %p983_p11 = scmp.ge.s32.totalorder %s1313_s23, 4 }
  0x12   : > { %s1420_s10 = scalar_select %p80_p8, %s1285_s16, %s82_s30  }
  0x13   : > { %172 = sbr.rel (%p983_p11) target bundleno = 40 (0x28), region = 20 }
  0x18   : > { %175 = sbr.rel (!%p1397_p5) target bundleno = 31 (0x1f), region = 24  ;;  %s177_s11 = sand.u32 (%p1397_p5), 1, %s1293_s18  }
  0x19   : > { %s1112_s12 = sshll.u32 (%p1397_p5), %s1305_s21, 3  ;;  %s1169_s13 = smul.u32 (%p1397_p5), 24, %s177_s11 }
  0x1a   : > { %s182_s27 = scalar_lea.vmem (%p1397_p5), %s1550_s0, %s1112_s12 }
  0x1b   : > { %v199_v0 = vld [vmem:[%s182_s27] sm:$0xff] (%p1397_p5)   ;;  %v203_v1 = vld [vmem:[%s182_s27 + $0x10] sm:$0xff] (%p1397_p5)   ;;  %s179_s28 = scalar_lea.vmem (%p1397_p5), [#allocation3], %s1169_s13 }
  0x1c   : > { %v207_v2 = vld [vmem:[%s182_s27 + $0x20] sm:$0xff] (%p1397_p5)   ;;  %200 = vst [vmem:[%s179_s28] sm:$0xff] (%p1397_p5), %v199_v0  }
  0x1d   : > { %204 = vst [vmem:[%s179_s28 + $0x8] sm:$0xff] %v203_v1  }
  0x1e   : > { %208 = vst [vmem:[%s179_s28 + $0x10] sm:$0xff] %v207_v2  }
  0x1f PF: > { %246 = sbr.rel (!%p1411_p9) target bundleno = 40 (0x28), region = 65  ;;  %s248_s29 = sand.u32 (%p1411_p9), 1, %s1285_s16  }
  0x20   : > { %s988_s30 = sshll.u32 (%p1411_p9), %s1305_s21, 1  ;;  %s986_s6 = sshll.u32 (%p1411_p9), %s248_s29, 4 }
  0x21   : > { %s1113_s7 = sshll.u32 (%p1411_p9), %s1309_s22, 3  ;;  %s250_s27 = scalar_lea.vmem (%p1411_p9), [#allocation4], %s986_s6 }
  0x22   : > { %s254_s11 = sadd.s32 (%p1411_p9), %s1113_s7, %s988_s30 }
  0x23   : > { %s990_s12 = sshll.u32 (%p1411_p9), %s254_s11, 2 }
  0x24   : > { %s256_s13 = scalar_lea.vmem %s1552_s2, %s990_s12 }
  0x25   : > { %v273_v3 = vld [vmem:[%s256_s13] sm:$0xff]   ;;  %v277_v4 = vld [vmem:[%s256_s13 + $0x10] sm:$0xff]  }
  0x26   : > { %274 = vst [vmem:[%s250_s27] sm:$0xff] %v273_v3  }
  0x27   : > { %278 = vst [vmem:[%s250_s27 + $0x8] sm:$0xff] %v277_v4  }
  0x28 PF: > { %p991_p12 = scmp.ge.s32.totalorder %s1313_s23, 1  ;;  %p321_p13 = scmp.lt.s32.totalorder %s1313_s23, 5 }
  0x2a   : > { %p322_p0 = pnand %p991_p12, %p321_p13 }
  0x2b   : > { %s994_s8 = sshll.u32 (!%p322_p0), %s1301_s20, 1  ;;  %s328_s28 = sand.u32 (!%p322_p0), 1, %s1289_s17  }
  0x2c   : > { %325 = sbr.rel (%p322_p0) target bundleno = 387 (0x183), region = 110  ;;  %p373_p1 = scmp.lt.s32.totalorder (!%p322_p0), %s994_s8, 3 }
  0x2d   : > { %s1170_s29 = smul.u32 (!%p322_p0), 24, %s328_s28  ;;  %s335_s30 = sand.u32 (!%p322_p0), 1, %s1281_s15  }
  0x2e   : > { %s1445_s6 = sshll.u32 (!%p322_p0), %s335_s30, 4  ;;  %s993_s13 = sshll.u32 (!%p322_p0), %s335_s30, 5 }
  0x2f   : > { %s1447_s11 = scalar_lea.vmem (!%p322_p0), [#allocation3], %s1170_s29  ;;  %s337_s17 = scalar_lea.vmem (!%p322_p0), [#allocation4], %s1445_s6 }
  0x30   : > { %s1506_s27 = scalar_lea.vmem (!%p322_p0), [#allocation5], %s993_s13 }
  0x31   : > { %s1573_s8 = smov (!%p373_p1, %s994_s8), 3  ;;  %v1137_v5 = vld [vmem:[%s1447_s11] sm:$0xff]   ;;  %v1164_v6 = vld [vmem:[%s1447_s11 + $0x8] sm:$0xff]   ;;  %vm409_vm0 = vcmask 261120   ;;  %v1166_v24 = vld [vmem:[%s337_s17 + $0x8] sm:$0xff]   ;;  %s1107_s15 = sshll.u32 (%p1415_p10), %s1297_s19, 1 }
  0x32   : > { %s1114_s7 = sshll.u32 %s1573_s8, 4  ;;  %v1133_v7 = vld [vmem:[%s337_s17] sm:$0xff]   ;;  %v1138_v8 = vunpack.c.l.bf16 %v1137_v5  ;;  %v1139_v9 = vunpack.c.h.bf16 %v1137_v5  ;;  %v1142_v10 = vunpack.c.l.bf16 %v1164_v6  ;;  %v1143_v11 = vunpack.c.h.bf16 %v1164_v6  ;;  %v1118_v42 = vld [vmem:[%s1551_s1 + $0x8] sm:$0xff]  ;;  %v1120_v44 = vld [vmem:[%s1551_s1 + $0x18] sm:$0xff]  ;;  %s1131_s30 = sshll.u32 (%p1415_p10), %s1301_s20, 3 }
  0x33   : > { %s377_s24 = scalar_lea.vmem %s1553_s3, %s1114_s7  ;;  %v1134_v13 = vunpack.c.l.bf16 %v1133_v7  ;;  %v1135_v14 = vunpack.c.h.bf16 %v1133_v7  ;;  %v1165_v25 = vld [vmem:[%s1447_s11 + $0x10] sm:$0xff]   ;;  %v1150_v28 = vunpack.c.l.bf16 %v1166_v24  ;;  %v1151_v29 = vunpack.c.h.bf16 %v1166_v24  ;;  %453 = vmatpush.bf16.msra.mxu1 %v1118_v42  ;;  %v1117_v43 = vld [vmem:[%s1551_s1] sm:$0xff]  ;;  %515 = vmatpush.bf16.msra.mxu3 %v1120_v44  ;;  %v1128_v53 = vld [vmem:[%s1551_s1 + $0x18] sm:$0xff]  ;;  %s828_s8 = sadd.s32 (%p1415_p10), %s1131_s30, %s1107_s15 }
  0x34   : > { %v1116_v12 = vld [vmem:[%s377_s24 + $0x8] sm:$0xff]  ;;  %v1115_v15 = vld [vmem:[%s377_s24] sm:$0xff]  ;;  %v1124_v20 = vld [vmem:[%s377_s24 + $0x18] sm:$0xff]  ;;  %v1146_v26 = vunpack.c.l.bf16 %v1165_v25  ;;  %v1147_v27 = vunpack.c.h.bf16 %v1165_v25  ;;  %s1109_s28 = sshll.u32 (%p1415_p10), %s828_s8, 3 }
  0x35   : > { %419 = vmatpush.bf16.msra.mxu0 %v1116_v12  ;;  %480 = vmatpush.bf16.msra.mxu2 %v1116_v12  ;;  %v394_v16 = vmul.f32 %v1138_v8, %v1134_v13  ;;  %v395_v17 = vmul.f32 %v1139_v9, %v1135_v14  ;;  %v468_v18 = vmul.f32 %v1142_v10, %v1134_v13  ;;  %v1123_v23 = vld [vmem:[%s377_s24 + $0x10] sm:$0xff]  ;;  %v1126_v46 = vld [vmem:[%s1551_s1 + $0x8] sm:$0xff]  ;;  %v1121_v48 = vld [vmem:[%s1551_s1 + $0x20] sm:$0xff]  ;;  %s830_s7 = scalar_lea.vmem (%p1415_p10), %s1554_s4, %s1109_s28 }
  0x36   : > { %v469_v19 = vmul.f32 %v1143_v11, %v1135_v14  ;;  %v534_v30 = vmul.f32 %v1146_v26, %v1134_v13  ;;  %v535_v31 = vmul.f32 %v1147_v27, %v1135_v14  ;;  %v615_v32 = vmul.f32 %v1150_v28, %v1138_v8  ;;  %v1119_v45 = vld [vmem:[%s1551_s1 + $0x10] sm:$0xff]  ;;  %v1122_v47 = vld [vmem:[%s1551_s1 + $0x28] sm:$0xff]  ;;  %v1125_v49 = vld [vmem:[%s1551_s1] sm:$0xff] }
  0x37   : > { %v396_v21 = vpack.c.bf16 %v395_v17, %v394_v16  ;;  %v616_v33 = vmul.f32 %v1151_v29, %v1139_v9  ;;  %v687_v36 = vmul.f32 %v1150_v28, %v1142_v10  ;;  %v688_v37 = vmul.f32 %v1151_v29, %v1143_v11  ;;  %454 = vmatpush.bf16.msra.mxu1 %v1117_v43  ;;  %v1127_v55 = vld [vmem:[%s1551_s1 + $0x10] sm:$0xff]  ;;  %v1130_v57 = vld [vmem:[%s1551_s1 + $0x28] sm:$0xff]  ;;  %v1129_v60 = vld [vmem:[%s1551_s1 + $0x20] sm:$0xff] }
  0x38   : > { %v470_v22 = vpack.c.bf16 %v469_v19, %v468_v18  ;;  %v536_v34 = vpack.c.bf16 %v535_v31, %v534_v30  ;;  %v751_v38 = vmul.f32 %v1150_v28, %v1146_v26  ;;  %v752_v39 = vmul.f32 %v1151_v29, %v1147_v27  ;;  %516 = vmatpush.bf16.msra.mxu3 %v1119_v45 }
  0x39   : > { %420 = vmatpush.bf16.msra.mxu0 %v1115_v15  ;;  %481 = vmatpush.bf16.msra.mxu2 %v1115_v15  ;;  %v617_v35 = vpack.c.bf16 %v616_v33, %v615_v32  ;;  %v689_v40 = vpack.c.bf16 %v688_v37, %v687_v36 }
  0x3a   : > { %v753_v41 = vpack.c.bf16 %v752_v39, %v751_v38 }
  0x3b   : > { %581 = vmatpush.bf16.msrb.mxu1 %v1122_v47 }
  0x3c   : > { %1005 = vmatmul.msk.bf16.vlgmr.msra.gmra.mxu0 %vm409_vm0, %v396_v21  ;;  %1017 = vmatmul.msk.bf16.vlgmr.msra.gmra.mxu2 %vm409_vm0, %v470_v22 }
  0x3d   : > { %639 = vmatpush.bf16.msrb.mxu2 %v1124_v20  ;;  %546 = vmatpush.bf16.msrb.mxu0 %v1116_v12 }
  0x3e   : > { %673 = vmatpush.bf16.msrb.mxu3 %v1126_v46 }
  0x3f   : > { %582 = vmatpush.bf16.msrb.mxu1 %v1121_v48 }
  0x41   : > { %640 = vmatpush.bf16.msrb.mxu2 %v1123_v23  ;;  %547 = vmatpush.bf16.msrb.mxu0 %v1115_v15 }
  0x42   : > { %674 = vmatpush.bf16.msrb.mxu3 %v1125_v49 }
  0x45   : > { %763 = vmatpush.bf16.msra.mxu2 %v1124_v20  ;;  %699 = vmatpush.bf16.msra.mxu0 %v1124_v20 }
  0x49   : > { %764 = vmatpush.bf16.msra.mxu2 %v1123_v23  ;;  %700 = vmatpush.bf16.msra.mxu0 %v1123_v23 }
  0x4c   : > { %1033 = vmatmul.msk.bf16.vlgmr.msrb.gmra.mxu0 %vm409_vm0, %v536_v34  ;;  %1061 = vmatmul.msk.bf16.vlgmr.msrb.gmra.mxu2 %vm409_vm0, %v617_v35 }
  0x5c   : > { %1073 = vmatmul.msk.bf16.vlgmr.msra.gmra.mxu0 %vm409_vm0, %v689_v40  ;;  %1089 = vmatmul.msk.bf16.vlgmr.msra.gmra.mxu2 %vm409_vm0, %v753_v41 }
  0xb9   : > { %v422_v50 = vpop.f32.mrf.mxu0 }
  0xbf   : > { %v483_v51 = vpop.f32.mrf.mxu2 }
  0xc1   : > { %v424_v52 = vpop.f32.mrf.mxu0 }
  0xc2   : > { %v427_v54 = vpack.c.bf16 %v424_v52, %v422_v50 }
  0xc4   : > { %1014 = vmatmul.msk.bf16.vlgmr.msra.gmra.mxu1 %vm409_vm0, %v427_v54 }
  0xc5   : > { %733 = vmatpush.bf16.msra.mxu1 %v1128_v53 }
  0xc7   : > { %v485_v56 = vpop.f32.mrf.mxu2 }
  0xc8   : > { %v488_v58 = vpack.c.bf16 %v485_v56, %v483_v51 }
  0xc9   : > { %v549_v59 = vpop.f32.mrf.mxu0  ;;  %734 = vmatpush.bf16.msra.mxu1 %v1127_v55 }
  0xca   : > { %1030 = vmatmul.msk.bf16.vlgmr.msra.gmra.mxu3 %vm409_vm0, %v488_v58 }
  0xcb   : > { %797 = vmatpush.bf16.msra.mxu3 %v1130_v57 }
  0xcf   : > { %v642_v61 = vpop.f32.mrf.mxu2  ;;  %798 = vmatpush.bf16.msra.mxu3 %v1129_v60 }
  0xd1   : > { %v551_v62 = vpop.f32.mrf.mxu0 }
  0xd2   : > { %v554_v63 = vpack.c.bf16 %v551_v62, %v549_v59 }
  0xd4   : > { %1046 = vmatmul.msk.bf16.vlgmr.msrb.gmra.mxu1 %vm409_vm0, %v554_v63 }
  0xd7   : > { %v644_v0 = vpop.f32.mrf.mxu2 }
  0xd8   : > { %v647_v1 = vpack.c.bf16 %v644_v0, %v642_v61 }
  0xd9   : > { %v702_v2 = vpop.f32.mrf.mxu0 }
  0xda   : > { %1070 = vmatmul.msk.bf16.vlgmr.msrb.gmra.mxu3 %vm409_vm0, %v647_v1 }
  0xdf   : > { %v766_v3 = vpop.f32.mrf.mxu2 }
  0xe1   : > { %v704_v4 = vpop.f32.mrf.mxu0 }
  0xe2   : > { %v707_v5 = vpack.c.bf16 %v704_v4, %v702_v2 }
  0xe4   : > { %1086 = vmatmul.msk.bf16.vlgmr.msra.gmra.mxu1 %vm409_vm0, %v707_v5 }
  0xe7   : > { %v768_v6 = vpop.f32.mrf.mxu2 }
  0xe8   : > { %v771_v7 = vpack.c.bf16 %v768_v6, %v766_v3 }
  0xea   : > { %1102 = vmatmul.msk.bf16.vlgmr.msra.gmra.mxu3 %vm409_vm0, %v771_v7 }
 0x141   : > { %v456_v8 = vpop.f32.mrf.mxu1 }
 0x149   : > { %v458_v9 = vpop.f32.mrf.mxu1 }
 0x14d   : > { %v518_v10 = vpop.f32.mrf.mxu3 }
 0x14e   : > { %v525_v11 = vadd.f32 %v518_v10, %v456_v8 }
 0x151   : > { %v584_v12 = vpop.f32.mrf.mxu1 }
 0x152   : > { %v591_v13 = vadd.f32 %v584_v12, %v525_v11 }
 0x154   : > { %v597_v14 = vmax.f32 %v591_v13, 0.0 }
 0x155   : > { %v520_v15 = vpop.f32.mrf.mxu3 }
 0x156   : > { %599 = vst [vmem:[%s1506_s27] sm:$0xff] %v597_v14  ;;  %v526_v16 = vadd.f32 %v520_v15, %v458_v9 }
 0x159   : > { %v586_v17 = vpop.f32.mrf.mxu1 }
 0x15a   : > { %v592_v18 = vadd.f32 %v586_v17, %v526_v16 }
 0x15c   : > { %v598_v19 = vmax.f32 %v592_v18, 0.0 }
 0x15d   : > { %v676_v20 = vpop.f32.mrf.mxu3  ;;  %v865_v32 = vld [vmem:[%s1506_s27] sm:$0xff] (%p1415_p10) }
 0x15e   : > { %600 = vst [vmem:[%s1506_s27 + $0x8] sm:$0xff] %v598_v19 }
 0x15f   : > { %866 = vst [vmem:[%s830_s7] sm:$0xff] (%p1415_p10), %v865_v32 }
 0x161   : > { %v736_v22 = vpop.f32.mrf.mxu1 }
 0x162   : > { %v743_v23 = vadd.f32 %v736_v22, %v676_v20 }
 0x165   : > { %v678_v21 = vpop.f32.mrf.mxu3  ;;  %v867_v33 = vld [vmem:[%s1506_s27 + $0x8] sm:$0xff] (%p1415_p10) }
 0x166   : > { %868 = vst [vmem:[%s830_s7 + $0x8] sm:$0xff] (%p1415_p10), %v867_v33 }
 0x169   : > { %v738_v27 = vpop.f32.mrf.mxu1 }
 0x16a   : > { %v744_v28 = vadd.f32 %v738_v27, %v678_v21 }
 0x16d   : > { %v800_v24 = vpop.f32.mrf.mxu3 }
 0x16e   : > { %v807_v25 = vadd.f32 %v800_v24, %v743_v23 }
 0x170   : > { %v813_v26 = vmax.f32 %v807_v25, 0.0 }
 0x172   : > { %1103 = vst [vmem:[%s1506_s27 + $0x10] sm:$0xff] %v813_v26 }
 0x175   : > { %v802_v29 = vpop.f32.mrf.mxu3 }
 0x176   : > { %v808_v30 = vadd.f32 %v802_v29, %v744_v28  ;;  %824 = sbr.rel (!%p1415_p10) target bundleno = 387 (0x183), region = 122 }
 0x178   : > { %v814_v31 = vmax.f32 %v808_v30, 0.0 }
 0x179   : > { %v869_v34 = vld [vmem:[%s1506_s27 + $0x10] sm:$0xff] (%p1415_p10) }
 0x17a   : > { %1104 = vst [vmem:[%s1506_s27 + $0x18] sm:$0xff] %v814_v31 }
 0x17b   : > { %870 = vst [vmem:[%s830_s7 + $0x20] sm:$0xff] %v869_v34 }
 0x181   : > { %v871_v35 = vld [vmem:[%s1506_s27 + $0x18] sm:$0xff] }
 0x182   : > { %872 = vst [vmem:[%s830_s7 + $0x28] sm:$0xff] %v871_v35 }
 0x183 PF: > { %s14_s23 = sadd.s32 1, %s1313_s23   ;;  %s1558_s15 = smov %s1285_s16 }
 0x184   : > { %p11_p2 = scmp.ge.s32.totalorder %s14_s23, 6   ;;  %s1559_s16 = smov %s1420_s10 }
 0x185   : > { %s1560_s17 = smov %s1293_s18  ;;  %s1561_s18 = smov %s1405_s5 }
 0x186   : > { %s1562_s19 = smov %s1305_s21  ;;  %s1563_s20 = smov %s1309_s22 }
 0x187   : > { %s1564_s21 = smov %s1567_s25  ;;  %s1565_s22 = smov %s1571_s26 }
 0x188   :  { %13 = sbr.rel (!%p11_p2) target bundleno = 5 (0x5), region = 209 }

</bundles_post_ra>
